<compile_context>
chip_gen: v5e
topology: v5e:2x2
jax: 0.10.0
libtpu: 0.0.40
codegen_flags: <defaults>
</compile_context>

<pallas_src>
import math
import functools

import jax
import jax.numpy as jnp
from jax.experimental import pallas as pl
from jax.experimental.pallas import tpu as pltpu


_LANE = 128                               # vreg lane width
_TARGET_BLOCK_BYTES = 6 * 1024 * 1024     # per x/out block (bits input removed on TPU)
_VMEM_LIMIT_BYTES = 48 * 1024 * 1024      # headroom under v7x's 64 MiB physical VMEM


def make_positional_encoding(d_model: int, max_len: int = 5000) -> jnp.ndarray:
    """(max_len, d_model) sin/cos table, identical to the PyTorch buffer."""
    position = jnp.arange(max_len, dtype=jnp.float32)[:, None]
    div_term = jnp.exp(
        jnp.arange(0, d_model, 2, dtype=jnp.float32) * (-math.log(10000.0) / d_model))
    pe = jnp.zeros((max_len, d_model), dtype=jnp.float32)
    pe = pe.at[:, 0::2].set(jnp.sin(position * div_term))
    pe = pe.at[:, 1::2].set(jnp.cos(position * div_term))
    return pe


def prepare_pe_row(pe_full: jnp.ndarray, seq_len: int, dtype) -> jnp.ndarray:
    """Slice + flatten pe to a lane-dense (1, S*D) row. Cache once per (S, dtype)."""
    return pe_full[:seq_len, :].reshape(1, -1).astype(dtype)


def _round_tile(value: int, full: int, quantum: int) -> int:
    """Largest tile <= value that is a multiple of `quantum`, or the full extent."""
    if full <= quantum or value >= full:
        return full
    return max(quantum, (min(value, full) // quantum) * quantum)


def _choose_tiles(rows: int, cols: int, itemsize: int):
    """Pick (tm, tc): lane-dense, dtype-aware sublane aligned, ~6 MiB per block."""
    sublane = max(8, 32 // itemsize)          # f32: 8, bf16/f16: 16, int8/fp8: 32
    max_elems = max(_TARGET_BLOCK_BYTES // itemsize, _LANE)
    row_quota = min(rows, sublane)
    tc = _round_tile(max(max_elems // max(row_quota, 1), _LANE), cols, _LANE)
    tm = _round_tile(max(max_elems // tc, 1), rows, sublane)
    return tm, tc


def _add_pe_kernel(x_ref, pe_ref, o_ref):
    # (tm, tc) + (1, tc) broadcast over rows; lane-dense store.
    o_ref[...] = (x_ref[...] + pe_ref[...]).astype(o_ref.dtype)


def _add_pe_dropout_prng_kernel(seed_ref, x_ref, pe_ref, o_ref, *, threshold: int,
                                scale: float):
    # Re-seed per grid block so every tile draws an independent stream.
    block_id = pl.program_id(0) * pl.num_programs(1) + pl.program_id(1)
    pltpu.prng_seed(seed_ref[0] + block_id * jnp.int32(1000003))
    bits = pltpu.bitcast(pltpu.prng_random_bits(x_ref.shape), jnp.uint32)
    y = x_ref[...] + pe_ref[...]
    keep = bits >= jnp.uint32(threshold)              # drop iff bits < threshold
    o_ref[...] = jnp.where(keep, y * scale, 0.0).astype(o_ref.dtype)


def _add_pe_dropout_bits_kernel(x_ref, pe_ref, bits_ref, o_ref, *, threshold: int,
                                scale: float):
    # Fallback path (non-TPU backends): uint8 bits streamed from the wrapper.
    y = x_ref[...] + pe_ref[...]
    keep = bits_ref[...] >= jnp.uint8(threshold)
    o_ref[...] = jnp.where(keep, y * scale, 0.0).astype(o_ref.dtype)


def positional_encoding_forward(x, pe, *, p: float = 0.1, training: bool = True,
                                dropout_seed=None, use_inkernel_prng=None):
    """x: (N, S, D).  pe: (max_len, D) table or pre-flattened (1, S*D) row.

    Returns dropout(x + pe[:S]) with the same semantics as the PyTorch module.
    """
    N, S, D = x.shape
    rows, cols = N, S * D
    itemsize = jnp.dtype(x.dtype).itemsize

    x2 = x.reshape(rows, cols)                        # lane-dense slab
    if pe.ndim == 2 and pe.shape == (1, cols):
        pe2 = pe.astype(x.dtype)                      # already prepared (hoisted)
    else:
        pe2 = prepare_pe_row(pe, S, x.dtype)

    apply_dropout = training and p > 0.0
    if apply_dropout and p >= 1.0:
        return jnp.zeros_like(x)                      # nn.Dropout(p=1) zeroes all
    if apply_dropout and dropout_seed is None:
        raise ValueError("training with dropout p>0 requires an explicit dropout_seed")

    if use_inkernel_prng is None:
        use_inkernel_prng = jax.default_backend() == "tpu"

    tm, tc = _choose_tiles(rows, cols, itemsize)
    n_col, n_row = pl.cdiv(cols, tc), pl.cdiv(rows, tm)

    # pe only varies with the column block index; keep cols outer (pe stays
    # VMEM-resident across the inner loop) when it actually splits, otherwise
    # put rows outer so the megacore-sharded axis has extent >= 2 on v7x.
    col_outer = n_col >= 2 or n_row == 1
    if col_outer:
        grid = (n_col, n_row)
        xmap = lambda c, r, *_: (r, c)
        pemap = lambda c, r, *_: (0, c)
    else:
        grid = (n_row, n_col)
        xmap = lambda r, c, *_: (r, c)
        pemap = lambda r, c, *_: (0, c)

    x_spec = pl.BlockSpec((tm, tc), xmap)
    pe_spec = pl.BlockSpec((1, tc), pemap)
    out_spec = pl.BlockSpec((tm, tc), xmap)
    out_shape = jax.ShapeDtypeStruct((rows, cols), x.dtype)
    cparams = pltpu.CompilerParams(
        dimension_semantics=("parallel", "parallel"),
        vmem_limit_bytes=_VMEM_LIMIT_BYTES)

    if not apply_dropout:
        out2 = pl.pallas_call(
            _add_pe_kernel,
            out_shape=out_shape,
            grid_spec=pltpu.PrefetchScalarGridSpec(
                num_scalar_prefetch=0, grid=grid,
                in_specs=[x_spec, pe_spec], out_specs=out_spec),
            compiler_params=cparams,
            cost_estimate=pl.CostEstimate(
                flops=rows * cols, transcendentals=0,
                bytes_accessed=(2 * rows * cols + cols) * itemsize),
        )(x2, pe2)
        return out2.reshape(N, S, D)

    scale = 1.0 / (1.0 - p)
    if use_inkernel_prng:
        # In-kernel hardware PRNG: no bits tensor in HBM, no wrapper RNG kernel.
        threshold = min(int(round(p * float(2 ** 32))), 2 ** 32 - 1)
        kernel = functools.partial(_add_pe_dropout_prng_kernel,
                                   threshold=threshold, scale=scale)
        seed = jnp.asarray([dropout_seed], dtype=jnp.int32)
        out2 = pl.pallas_call(
            kernel,
            out_shape=out_shape,
            grid_spec=pltpu.PrefetchScalarGridSpec(
                num_scalar_prefetch=1, grid=grid,
                in_specs=[x_spec, pe_spec], out_specs=out_spec),
            compiler_params=cparams,
            cost_estimate=pl.CostEstimate(
                flops=3 * rows * cols, transcendentals=0,
                bytes_accessed=(2 * rows * cols + cols) * itemsize),
        )(seed, x2, pe2)
    else:
        # Non-TPU / interpret fallback: uint8 bits (1 B/elem, was 4 B/elem).
        threshold = min(int(round(p * 256.0)), 255)
        kernel = functools.partial(_add_pe_dropout_bits_kernel,
                                   threshold=threshold, scale=scale)
        bits = jax.random.bits(jax.random.PRNGKey(int(dropout_seed)), (rows, cols),
                               dtype=jnp.uint8)
        bits_spec = pl.BlockSpec((tm, tc), xmap)
        out2 = pl.pallas_call(
            kernel,
            out_shape=out_shape,
            grid_spec=pltpu.PrefetchScalarGridSpec(
                num_scalar_prefetch=0, grid=grid,
                in_specs=[x_spec, pe_spec, bits_spec], out_specs=out_spec),
            compiler_params=cparams,
            cost_estimate=pl.CostEstimate(
                flops=3 * rows * cols, transcendentals=0,
                bytes_accessed=(2 * rows * cols + cols) * itemsize + rows * cols),
        )(x2, pe2, bits)
    return out2.reshape(N, S, D)


if __name__ == "__main__":
    # TODO(synk): the rest of Net (atom embedding, the three TransformerEncoder
    # stacks, mean-pooling and the fc1/fc2/fc3 MLP head, plus the losses) is not
    # implemented here; this kernel covers the PositionalEncoding blocks.
    N, S, D = 2, 8, 32
    x = jax.random.normal(jax.random.PRNGKey(0), (N, S, D), dtype=jnp.float32)
    pe_full = make_positional_encoding(d_model=D, max_len=5000)
    pe_row = prepare_pe_row(pe_full, S, x.dtype)      # hoisted once per (S, dtype)

    p = 0.1
    out_eval = positional_encoding_forward(x, pe_row, p=p, training=False)
    out_eval = jax.block_until_ready(out_eval)

    out_train = positional_encoding_forward(x, pe_row, p=p, training=True,
                                            dropout_seed=1234)
    out_train = jax.block_until_ready(out_train)

    # Eval mode must exactly match the pure-JAX reference (dropout is identity).
    ref = x + pe_full[None, :S, :]
    assert jnp.allclose(out_eval, ref, atol=1e-6), "eval-mode mismatch"

    # Training mode: every element is either dropped (0) or the scaled sum.
    scaled = ref / (1.0 - p)
    ok = jnp.logical_or(jnp.isclose(out_train, 0.0, atol=1e-6),
                        jnp.isclose(out_train, scaled, atol=1e-5, rtol=1e-5))
    assert bool(jnp.all(ok)), "training-mode dropout structure mismatch"
    assert bool(jnp.any(jnp.abs(out_train) > 1e-6)), "dropout zeroed everything"

    print("KERNEL_OK")
</pallas_src>

<mosaic_0001>
module attributes {stable_mosaic.version = 11 : i64} {
  func.func @_add_pe_kernel(%arg0: i32, %arg1: i32, %arg2: memref<2x256xf32, #tpu.memory_space<vmem>>, %arg3: memref<1x256xf32, #tpu.memory_space<vmem>>, %arg4: memref<2x256xf32, #tpu.memory_space<vmem>>) attributes {dimension_semantics = [#tpu.dimension_semantics<parallel>, #tpu.dimension_semantics<parallel>], iteration_bounds = array<i64: 1, 1>, scalar_prefetch = 0 : i64, scratch_operands = 0 : i64, tpu.core_type = #tpu.core_type<tc>, window_params = [{transform_indices = @transform_0, window_bounds = array<i64: 2, 256>}, {transform_indices = @transform_1, window_bounds = array<i64: 1, 256>}, {transform_indices = @transform_2, window_bounds = array<i64: 2, 256>}]} {
    %c0 = arith.constant 0 : index
    %c0_0 = arith.constant 0 : index
    %0 = vector.load %arg2[%c0, %c0_0] : memref<2x256xf32, #tpu.memory_space<vmem>>, vector<2x256xf32>
    %c0_1 = arith.constant 0 : index
    %c0_2 = arith.constant 0 : index
    %1 = vector.load %arg3[%c0_1, %c0_2] : memref<1x256xf32, #tpu.memory_space<vmem>>, vector<1x256xf32>
    %2 = vector.broadcast %1 : vector<1x256xf32> to vector<2x256xf32>
    %3 = arith.addf %0, %2 : vector<2x256xf32>
    %c0_3 = arith.constant 0 : index
    %c0_4 = arith.constant 0 : index
    %4 = vector.load %arg4[%c0_3, %c0_4] : memref<2x256xf32, #tpu.memory_space<vmem>>, vector<2x256xf32>
    tpu.vector_store %arg4[%c0_3, %c0_4], %3 {strides = array<i32>} : memref<2x256xf32, #tpu.memory_space<vmem>>, vector<2x256xf32>,
    return
  }
  func.func @transform_0(%arg0: i32, %arg1: i32) -> (i32, i32) {
    %c0_i32 = arith.constant 0 : i32
    return %arg1, %arg0 : i32, i32
  }
  func.func @transform_1(%arg0: i32, %arg1: i32) -> (i32, i32) {
    %c0_i32 = arith.constant 0 : i32
    %c0_i32_0 = arith.constant 0 : i32
    return %c0_i32, %arg0 : i32, i32
  }
  func.func @transform_2(%arg0: i32, %arg1: i32) -> (i32, i32) {
    %c0_i32 = arith.constant 0 : i32
    return %arg1, %arg0 : i32, i32
  }
}

</mosaic_0001>

<bundles_post_ra>
// kernel: tpu_custom_call.1
= control target key start
LH: loop header
LB: loop body
LE: loop exit
PB: predicated region body
PF: predicated region fallthrough
CT: control target
= control target key end

     0   :  { %7 = vsyncpa [#allocation3], 0  ;;  %s177_s0 = inlined_call_operand.hbm [shape: f32[2,256], index: 0, kind: input, shape index: {}]   ;;  %s178_s1 = inlined_call_operand.hbm [shape: f32[1,256], index: 1, kind: input, shape index: {}]   ;;  %s179_s2 = inlined_call_operand.hbm [shape: f32[2,256], index: 2, kind: output, shape index: {}]  }
   0x1   :  { %8 = vsyncpa [#allocation6], 0 }
   0x2   :  { %9 = vsyncpa [#allocation4], 0  ;;  %s15_s11 = sshll.u32 %s177_s0, 4  ;;  %s150_s12 = smov [#allocation2]   ;;  %s16_s11 = int_to_ptr.hbm [resolvable:$true] %s15_s11 }
   0x3   :  { %s17_s13 = sshll.u32 %s150_s12, 4  ;;  %s26_s16 = sshll.u32 %s178_s1, 4  ;;  %s18_s13 = int_to_ptr.vmem [resolvable:$true] %s17_s13  ;;  %s27_s16 = int_to_ptr.hbm [resolvable:$true] %s26_s16 }
   0x4   :  { %20 = dma.hbm_to_vmem [thread:$0]  %s16_s11, 64, %s18_s13, [#allocation3]  }
   0x5   :  { %s151_s17 = smov [#allocation5]  }
   0x6   :  { %s28_s18 = sshll.u32 %s151_s17, 4  ;;  %s29_s18 = int_to_ptr.vmem [resolvable:$true] %s28_s18 }
   0x7   :  { %31 = dma.hbm_to_vmem [thread:$0]  %s27_s16, 32, %s29_s18, [#allocation6]  }
   0x8   :  { %144 = dma.done.wait [#allocation3], 64  }
   0x9   :  { %145 = vsyncadd [#allocation3], 4294967232 }
   0xa   :  { %146 = dma.done.wait [#allocation6], 32  }
   0xb   :  { %147 = vsyncadd [#allocation6], 4294967264  ;;  %v41_v0 = vld [vmem:[#allocation5] sm:$0x3]  ;;  %vm46_vm0 = vcmask 1041408   ;;  %s152_s0 = smov [#allocation7]  }
   0xc   :  { %v43_v1 = vperm.slane %v41_v0, 0  ;;  %v44_v2 = vperm.slane %v41_v0, 1  ;;  %v40_v3 = vld [vmem:[#allocation2] sm:$0xf]  ;;  %s56_s19 = sshll.u32 %s152_s0, 4  ;;  %s58_s21 = sshll.u32 %s179_s2, 4  ;;  %s57_s19 = int_to_ptr.vmem [resolvable:$true] %s56_s19  ;;  %s59_s21 = int_to_ptr.hbm [resolvable:$true] %s58_s21 }
   0xe   :  { %v45_v4 = vrot.slane %v44_v2, 6 }
  0x10   :  { %v47_v5 = vsel %vm46_vm0, %v43_v1, %v45_v4 }
  0x11   :  { %v49_v6 = vadd.f32 %v47_v5, %v40_v3 }
  0x13   :  { %50 = vst [vmem:[#allocation7] sm:$0xf] %v49_v6 }
  0x14   :  { %61 = dma.vmem_to_hbm [thread:$0]  %s57_s19, 64, %s59_s21, [#allocation4]  }
  0x15   :  { %148 = dma.done.wait [#allocation4], 64  }
  0x16   :  { %149 = vsyncadd [#allocation4], 4294967232 }
  0x17   :  { %66 = vsyncpa [#allocation3], 1 }
  0x18   :  { %67 = vsyncpa [#allocation6], 1 }
  0x19   :  { %68 = vsyncpa [#allocation4], 1 }

</bundles_post_ra>
